<compile_context>
chip_gen: v7x
topology: tpu7x:2x2x1
jax: 0.10.0
libtpu: 0.0.40
codegen_flags: <defaults>
</compile_context>

<pallas_src>
import jax
import jax.numpy as jnp
from jax.experimental import pallas as pl
from jax.experimental.pallas import tpu as pltpu

EPS = 1e-5


def _stats_kernel(xt_ref, w_ref, stats_ref, sum_sc, ssq_sc):
    """Phase 1: accumulate per-channel sum and sum-of-squares of h = W @ x^T.

    xt_ref:    (C, TM)  column tile of x^T
    w_ref:     (C, C)   Linear weight (out, in)
    stats_ref: (C, 2)   output: [:,0] = sum_m h, [:,1] = sum_m h^2
    sum_sc, ssq_sc: (C, 1) f32 VMEM accumulators
    """
    t = pl.program_id(0)

    @pl.when(t == 0)
    def _():
        sum_sc[...] = jnp.zeros_like(sum_sc)
        ssq_sc[...] = jnp.zeros_like(ssq_sc)

    # Linear bias omitted: it cancels exactly against the BN mean subtraction.
    h = jnp.dot(w_ref[...], xt_ref[...], preferred_element_type=jnp.float32)
    sum_sc[...] += jnp.sum(h, axis=1, keepdims=True)
    ssq_sc[...] += jnp.sum(h * h, axis=1, keepdims=True)

    @pl.when(t == pl.num_programs(0) - 1)
    def _():
        stats_ref[:, 0:1] = sum_sc[...]
        stats_ref[:, 1:2] = ssq_sc[...]


def _apply_kernel(xt_ref, w_ref, ss_ref, yt_ref):
    """Phase 2: recompute h = W @ x^T per tile and apply the folded BN affine
    (y = h*scale + shift) followed by ReLU.  Output is lane-dense (last dim TM).

    ss_ref: (C, 2)  [:,0] = scale = gamma*inv_std, [:,1] = shift = beta - scale*mean
    """
    h = jnp.dot(w_ref[...], xt_ref[...], preferred_element_type=jnp.float32)
    scale = ss_ref[:, 0:1]
    shift = ss_ref[:, 1:2]
    y = h * scale + shift
    yt_ref[...] = jnp.maximum(y, 0.0).astype(yt_ref.dtype)


def fc_forward(x_nchw, w, b, gamma, beta, *, tile_m=1024,
               compute_dtype=jnp.float32):
    """x_nchw: (B, C, H, W).  w: (C, C) Linear weight (out, in).  b: (C,)
    Linear bias (accepted for API parity; mathematically cancelled by the
    training-mode BN mean subtraction and never read)."""
    del b  # (xW^T + b) - mean(xW^T + b) == xW^T - mean(xW^T)

    B, C, H, W = x_nchw.shape
    M = B * H * W

    # NCHW -> (C, M): single leading-axis permute (cheaper than NCHW->NHWC).
    xt = jnp.transpose(x_nchw, (1, 0, 2, 3)).reshape(C, M)

    # Tile the M (lane) axis; pad M up to a multiple of the tile.  Padded zero
    # columns contribute exactly 0 to sum/sumsq (no bias) and we divide by the
    # true M, so the batch statistics are unaffected.
    tm = min(tile_m, -(-M // 128) * 128)          # multiple of 128, >= 128
    num_tiles = -(-M // tm)
    m_pad = num_tiles * tm
    if m_pad != M:
        xt = jnp.pad(xt, ((0, 0), (0, m_pad - M)))

    xt_c = xt.astype(compute_dtype)
    w_c = w.astype(compute_dtype)

    # ---------------- phase 1: per-channel sum / sumsq ----------------
    stats = pl.pallas_call(
        _stats_kernel,
        out_shape=jax.ShapeDtypeStruct((C, 2), jnp.float32),
        grid=(num_tiles,),
        in_specs=[
            pl.BlockSpec((C, tm), lambda t: (0, t)),
            pl.BlockSpec((C, C), lambda t: (0, 0)),
        ],
        out_specs=pl.BlockSpec((C, 2), lambda t: (0, 0)),
        scratch_shapes=[
            pltpu.VMEM((C, 1), jnp.float32),
            pltpu.VMEM((C, 1), jnp.float32),
        ],
        compiler_params=pltpu.CompilerParams(
            dimension_semantics=("arbitrary",)),
    )(xt_c, w_c)

    # Fold BN into per-channel scale/shift (tiny O(C) math, f32 throughout).
    # Guard E[h^2]-E[h]^2 against tiny negative values from cancellation.
    mean = stats[:, 0] / M
    var = jnp.maximum(stats[:, 1] / M - mean * mean, 0.0)
    scale = gamma * jax.lax.rsqrt(var + EPS)
    shift = beta - scale * mean
    ss = jnp.stack([scale, shift], axis=1).astype(jnp.float32)   # (C, 2)

    # ------------- phase 2: recompute matmul, normalize, ReLU -------------
    yt = pl.pallas_call(
        _apply_kernel,
        out_shape=jax.ShapeDtypeStruct((C, m_pad), x_nchw.dtype),
        grid=(num_tiles,),
        in_specs=[
            pl.BlockSpec((C, tm), lambda t: (0, t)),
            pl.BlockSpec((C, C), lambda t: (0, 0)),
            pl.BlockSpec((C, 2), lambda t: (0, 0)),
        ],
        out_specs=pl.BlockSpec((C, tm), lambda t: (0, t)),
        compiler_params=pltpu.CompilerParams(
            dimension_semantics=("parallel",)),
    )(xt_c, w_c, ss)

    # (C, M) -> (C, B, H, W) -> NCHW
    return jnp.transpose(yt[:, :M].reshape(C, B, H, W), (1, 0, 2, 3))


def fc_reference(x_nchw, w, b, gamma, beta):
    """Pure-JAX reference mirroring the PyTorch forward (training-mode BN,
    including the Linear bias, to verify the bias-cancellation empirically)."""
    x = jnp.transpose(x_nchw, (0, 2, 3, 1))          # NHWC
    h = x @ w.T + b
    h = jnp.transpose(h, (0, 3, 1, 2))                # NCHW
    mean = jnp.mean(h, axis=(0, 2, 3), keepdims=True)
    var = jnp.mean((h - mean) ** 2, axis=(0, 2, 3), keepdims=True)
    y = gamma[None, :, None, None] * (h - mean) * jax.lax.rsqrt(var + EPS) \
        + beta[None, :, None, None]
    return jnp.maximum(y, 0.0)


if __name__ == "__main__":
    key = jax.random.PRNGKey(0)
    B, C, H, W = 2, 32, 8, 8                          # dims = C = 32
    k_x, k_w, k_b, k_g, k_bt = jax.random.split(key, 5)

    x = jax.random.normal(k_x, (B, C, H, W), dtype=jnp.float32)
    bound = 1.0 / (C ** 0.5)
    w = jax.random.uniform(k_w, (C, C), minval=-bound, maxval=bound,
                           dtype=jnp.float32)         # Linear.weight (out, in)
    b = jax.random.uniform(k_b, (C,), minval=-bound, maxval=bound,
                           dtype=jnp.float32)         # Linear.bias
    gamma = 1.0 + 0.1 * jax.random.normal(k_g, (C,), dtype=jnp.float32)  # BN weight
    beta = 0.1 * jax.random.normal(k_bt, (C,), dtype=jnp.float32)        # BN bias

    ref = fc_reference(x, w, b, gamma, beta)

    # f32 path
    out = fc_forward(x, w, b, gamma, beta)
    jax.block_until_ready(out)
    assert out.shape == (B, C, H, W)
    assert jnp.allclose(out, ref, atol=1e-4, rtol=1e-4), "f32 mismatch vs reference"

    # bf16 matmul-operand path (halves HBM read traffic on v6e/v7x);
    # BN statistics and accumulation stay in f32, so only matmul rounding differs.
    out_bf16 = fc_forward(x, w, b, gamma, beta, compute_dtype=jnp.bfloat16)
    jax.block_until_ready(out_bf16)
    assert jnp.allclose(out_bf16, ref, atol=1e-1, rtol=1e-1), "bf16 mismatch vs reference"

    print("KERNEL_OK")
</pallas_src>

<mosaic_0001>
module attributes {stable_mosaic.version = 11 : i64} {
  func.func @_stats_kernel(%arg0: i32, %arg1: memref<32x128xf32, #tpu.memory_space<vmem>>, %arg2: memref<32x32xf32, #tpu.memory_space<vmem>>, %arg3: memref<32x2xf32, #tpu.memory_space<vmem>>, %arg4: memref<32x1xf32, #tpu.memory_space<vmem>>, %arg5: memref<32x1xf32, #tpu.memory_space<vmem>>) attributes {dimension_semantics = [#tpu.dimension_semantics<arbitrary>], iteration_bounds = array<i64: 1>, scalar_prefetch = 0 : i64, scratch_operands = 2 : i64, tpu.core_type = #tpu.core_type<tc>, window_params = [{transform_indices = @transform_0, window_bounds = array<i64: 32, 128>}, {pipeline_mode = #tpu.pipeline_mode<synchronous>, transform_indices = @transform_1, window_bounds = array<i64: 32, 32>}, {pipeline_mode = #tpu.pipeline_mode<synchronous>, transform_indices = @transform_2, window_bounds = array<i64: 32, 2>}]} {
    %c0_i32 = arith.constant 0 : i32
    %0 = arith.cmpi eq, %arg0, %c0_i32 : i32
    %1 = arith.extui %0 : i1 to i32
    %c0_i32_0 = arith.constant 0 : i32
    %2 = arith.cmpi ne, %1, %c0_i32_0 : i32
    scf.if %2 {
      %cst_16 = arith.constant 0.000000e+00 : f32
      %20 = vector.broadcast %cst_16 : f32 to vector<32x1xf32>
      %c0_17 = arith.constant 0 : index
      %c0_18 = arith.constant 0 : index
      %21 = vector.load %arg4[%c0_17, %c0_18] : memref<32x1xf32, #tpu.memory_space<vmem>>, vector<32x1xf32>
      tpu.vector_store %arg4[%c0_17, %c0_18], %20 {strides = array<i32>} : memref<32x1xf32, #tpu.memory_space<vmem>>, vector<32x1xf32>,
      %cst_19 = arith.constant 0.000000e+00 : f32
      %22 = vector.broadcast %cst_19 : f32 to vector<32x1xf32>
      %c0_20 = arith.constant 0 : index
      %c0_21 = arith.constant 0 : index
      %23 = vector.load %arg5[%c0_20, %c0_21] : memref<32x1xf32, #tpu.memory_space<vmem>>, vector<32x1xf32>
      tpu.vector_store %arg5[%c0_20, %c0_21], %22 {strides = array<i32>} : memref<32x1xf32, #tpu.memory_space<vmem>>, vector<32x1xf32>,
    } else {
    }
    %c0 = arith.constant 0 : index
    %c0_1 = arith.constant 0 : index
    %3 = vector.load %arg2[%c0, %c0_1] : memref<32x32xf32, #tpu.memory_space<vmem>>, vector<32x32xf32>
    %c0_2 = arith.constant 0 : index
    %c0_3 = arith.constant 0 : index
    %4 = vector.load %arg1[%c0_2, %c0_3] : memref<32x128xf32, #tpu.memory_space<vmem>>, vector<32x128xf32>
    %cst = arith.constant dense<0.000000e+00> : vector<32x128xf32>
    %5 = tpu.matmul %3, %4, %cst {dimension_numbers = #tpu.dot_dimension_numbers<[1], [0], [0], [1], [0, 0, 1, 1], [], []>} : vector<32x32xf32>, vector<32x128xf32>, vector<32x128xf32> -> vector<32x128xf32>
    %c0_4 = arith.constant 0 : index
    %c0_5 = arith.constant 0 : index
    %6 = vector.load %arg4[%c0_4, %c0_5] : memref<32x1xf32, #tpu.memory_space<vmem>>, vector<32x1xf32>
    %cst_6 = arith.constant dense<0.000000e+00> : vector<32xf32>
    %7 = vector.multi_reduction <add>, %5, %cst_6 [1] : vector<32x128xf32> to vector<32xf32>
    %8 = vector.shape_cast %7 : vector<32xf32> to vector<32x1xf32>
    %9 = arith.addf %6, %8 : vector<32x1xf32>
    %c0_7 = arith.constant 0 : index
    %c0_8 = arith.constant 0 : index
    %10 = vector.load %arg4[%c0_7, %c0_8] : memref<32x1xf32, #tpu.memory_space<vmem>>, vector<32x1xf32>
    tpu.vector_store %arg4[%c0_7, %c0_8], %9 {strides = array<i32>} : memref<32x1xf32, #tpu.memory_space<vmem>>, vector<32x1xf32>,
    %c0_9 = arith.constant 0 : index
    %c0_10 = arith.constant 0 : index
    %11 = vector.load %arg5[%c0_9, %c0_10] : memref<32x1xf32, #tpu.memory_space<vmem>>, vector<32x1xf32>
    %12 = arith.mulf %5, %5 : vector<32x128xf32>
    %cst_11 = arith.constant dense<0.000000e+00> : vector<32xf32>
    %13 = vector.multi_reduction <add>, %12, %cst_11 [1] : vector<32x128xf32> to vector<32xf32>
    %14 = vector.shape_cast %13 : vector<32xf32> to vector<32x1xf32>
    %15 = arith.addf %11, %14 : vector<32x1xf32>
    %c0_12 = arith.constant 0 : index
    %c0_13 = arith.constant 0 : index
    %16 = vector.load %arg5[%c0_12, %c0_13] : memref<32x1xf32, #tpu.memory_space<vmem>>, vector<32x1xf32>
    tpu.vector_store %arg5[%c0_12, %c0_13], %15 {strides = array<i32>} : memref<32x1xf32, #tpu.memory_space<vmem>>, vector<32x1xf32>,
    %c0_i32_14 = arith.constant 0 : i32
    %17 = arith.cmpi eq, %arg0, %c0_i32_14 : i32
    %18 = arith.extui %17 : i1 to i32
    %c0_i32_15 = arith.constant 0 : i32
    %19 = arith.cmpi ne, %18, %c0_i32_15 : i32
    scf.if %19 {
      %c0_16 = arith.constant 0 : index
      %c0_17 = arith.constant 0 : index
      %20 = vector.load %arg4[%c0_16, %c0_17] : memref<32x1xf32, #tpu.memory_space<vmem>>, vector<32x1xf32>
      %c0_18 = arith.constant 0 : index
      %c0_19 = arith.constant 0 : index
      %21 = vector.load %arg3[%c0_18, %c0_19] : memref<32x2xf32, #tpu.memory_space<vmem>>, vector<32x1xf32>
      tpu.vector_store %arg3[%c0_18, %c0_19], %20 {strides = array<i32>} : memref<32x2xf32, #tpu.memory_space<vmem>>, vector<32x1xf32>,
      %c0_20 = arith.constant 0 : index
      %c0_21 = arith.constant 0 : index
      %22 = vector.load %arg5[%c0_20, %c0_21] : memref<32x1xf32, #tpu.memory_space<vmem>>, vector<32x1xf32>
      %c0_22 = arith.constant 0 : index
      %c1 = arith.constant 1 : index
      %23 = vector.load %arg3[%c0_22, %c1] : memref<32x2xf32, #tpu.memory_space<vmem>>, vector<32x1xf32>
      tpu.vector_store %arg3[%c0_22, %c1], %22 {strides = array<i32>} : memref<32x2xf32, #tpu.memory_space<vmem>>, vector<32x1xf32>,
    } else {
    }
    return
  }
  func.func @transform_0(%arg0: i32) -> (i32, i32) {
    %c0_i32 = arith.constant 0 : i32
    %c0_i32_0 = arith.constant 0 : i32
    return %c0_i32, %arg0 : i32, i32
  }
  func.func @transform_1(%arg0: i32) -> (i32, i32) {
    %c0_i32 = arith.constant 0 : i32
    %c0_i32_0 = arith.constant 0 : i32
    %c0_i32_1 = arith.constant 0 : i32
    return %c0_i32, %c0_i32_0 : i32, i32
  }
  func.func @transform_2(%arg0: i32) -> (i32, i32) {
    %c0_i32 = arith.constant 0 : i32
    %c0_i32_0 = arith.constant 0 : i32
    %c0_i32_1 = arith.constant 0 : i32
    return %c0_i32, %c0_i32_0 : i32, i32
  }
}

</mosaic_0001>

<bundles_post_ra>
// kernel: tpu_custom_call.1
= control target key start
LH: loop header
LB: loop body
LE: loop exit
PB: predicated region body
PF: predicated region fallthrough
CT: control target
= control target key end

     0   :  { %7 = vsyncpa [#allocation5], 0  ;;  %s430_s0 = inlined_call_operand.hbm [shape: f32[32,128], index: 0, kind: input, shape index: {}]   ;;  %s431_s1 = inlined_call_operand.hbm [shape: f32[32,32], index: 1, kind: input, shape index: {}]   ;;  %s432_s2 = inlined_call_operand.vmem [shape: f32[32,2], index: 2, kind: output, shape index: {}]  }
   0x1   :  { %8 = vsyncpa [#allocation7], 0  ;;  %s337_s9 = smov [#allocation4]   ;;  %s289_s13 = scalar_lea.hbm %s430_s0, 512 }
   0x2   :  { %s14_s10 = sshll.u32 %s337_s9, 4  ;;  %p290_p0 = scmp.ne.s32.totalorder %s430_s0, %s289_s13  ;;  %s15_s10 = int_to_ptr.vmem [resolvable:$true] %s14_s10 }
   0x3   :  { %p293_p1 = scmp.lt.u32.totalorder %s289_s13, %s430_s0 }
   0x5   :  { %p295_p2 = pnand %p293_p1, %p290_p0 }
   0x7   :  { %298 = shalt.err (!%p295_p2)
}
   0x8   :  { %s299_s18 = scalar_lea.vmem %s15_s10, 512  ;;  %p304_p4 = scmp.lt.s32.totalorder %s15_s10, %s15_s10 }
   0x9   :  { %p300_p3 = scmp.ne.s32.totalorder %s15_s10, %s299_s18  ;;  %p305_p5 = scmp.lt.s32.totalorder %s299_s18, %s299_s18 }
   0xb   :  { %p306_p6 = por %p305_p5, %p304_p4 }
   0xd   :  { %p307_p7 = pnand %p306_p6, %p300_p3 }
   0xf   :  { %310 = shalt.err (!%p307_p7)
}
  0x10   :  { %s338_s19 = smov 128   ;;  %s339_s20 = smov 8  }
  0x11   :  { %20 = dma.hbm_to_vmem [thread:$0]  %s430_s0, 512, %s15_s10, [#allocation5], %s338_s19, %s338_s19, %s339_s20  }
  0x12   :  { %s340_s23 = smov [#allocation6]   ;;  %s311_s27 = scalar_lea.hbm %s431_s1, 512 }
  0x13   :  { %s26_s24 = sshll.u32 %s340_s23, 4  ;;  %p312_p8 = scmp.ne.s32.totalorder %s431_s1, %s311_s27  ;;  %s27_s24 = int_to_ptr.vmem [resolvable:$true] %s26_s24 }
  0x14   :  { %p315_p9 = scmp.lt.u32.totalorder %s311_s27, %s431_s1 }
  0x16   :  { %p317_p10 = pnand %p315_p9, %p312_p8 }
  0x18   :  { %320 = shalt.err (!%p317_p10)
}
  0x19   :  { %s321_s4 = scalar_lea.vmem %s27_s24, 512  ;;  %p326_p12 = scmp.lt.s32.totalorder %s27_s24, %s27_s24 }
  0x1a   :  { %p322_p11 = scmp.ne.s32.totalorder %s27_s24, %s321_s4  ;;  %p327_p13 = scmp.lt.s32.totalorder %s321_s4, %s321_s4 }
  0x1c   :  { %p328_p0 = por %p327_p13, %p326_p12 }
  0x1e   :  { %p329_p1 = pnand %p328_p0, %p322_p11 }
  0x20   :  { %332 = shalt.err (!%p329_p1)
}
  0x21   :  { %32 = dma.hbm_to_vmem [thread:$0]  %s431_s1, 512, %s27_s24, [#allocation7], %s338_s19, %s338_s19, %s339_s20  }
  0x22   :  { %333 = dma.done.wait [#allocation5], 512  }
  0x23   :  { %334 = vsyncadd [#allocation5], 4294966784 }
  0x24   :  { %335 = dma.done.wait [#allocation7], 512  }
  0x25   :  { %336 = vsyncadd [#allocation7], 4294966784  ;;  %vm60_vm0 = vcmask 261120   ;;  %v56_v0 = vld [vmem:[#allocation4] sm:$0xff]  ;;  %v57_v1 = vld [vmem:[#allocation4 + $0x8] sm:$0xff]  ;;  %vm43_vm1 = vcmask 7168  }
  0x26   :  { %v58_v2 = vld [vmem:[#allocation4 + $0x10] sm:$0xff]  ;;  %v271_v3 = vpack.c.bf16 %v57_v1, %v56_v0  ;;  %v59_v4 = vld [vmem:[#allocation4 + $0x18] sm:$0xff]  ;;  %v52_v5 = vld [vmem:[#allocation6] sm:$0xff]  ;;  %v341_v10 = vmov 0.0   ;;  %s342_s1 = smov 1   ;;  %vm234_vm2 = vcmask 15368  }
  0x27   :  { %v54_v6 = vld [vmem:[#allocation6 + $0x10] sm:$0xff]  ;;  %v275_v7 = vpack.c.bf16 %v59_v4, %v58_v2  ;;  %265 = vmatprep.mubr.msk.f32.mxu0 %vm60_vm0, %v52_v5  ;;  %v53_v8 = vld [vmem:[#allocation6 + $0x8] sm:$0xff]  ;;  %v55_v9 = vld [vmem:[#allocation6 + $0x18] sm:$0xff]  ;;  %50 = vst.msk [vmem:[#allocation3 + $0x10] sm:$0xff] %vm43_vm1, %v341_v10 }
  0x28   :  { %268 = vmatprep.mubr.msk.f32.mxu1 %vm60_vm0, %v54_v6  ;;  %272 = vmatprep.subr.bf16.mxu0 %v271_v3  ;;  %44 = vst.msk [vmem:[#allocation2] sm:$0xff] %vm43_vm1, %v341_v10  ;;  %45 = vst.msk [vmem:[#allocation2 + $0x8] sm:$0xff] %vm43_vm1, %v341_v10 }
  0x29   :  { %279 = vmatprep.subr.bf16.mxu1 %v271_v3  ;;  %274 = vmatpush3.bf16.msra.mxu0 %v271_v3  ;;  %46 = vst.msk [vmem:[#allocation2 + $0x10] sm:$0xff] %vm43_vm1, %v341_v10  ;;  %47 = vst.msk [vmem:[#allocation2 + $0x18] sm:$0xff] %vm43_vm1, %v341_v10 }
  0x2a   :  { %281 = vmatpush3.bf16.msra.mxu1 %v271_v3  ;;  %276 = vmatprep.subr.bf16.mxu0 %v275_v7  ;;  %48 = vst.msk [vmem:[#allocation3] sm:$0xff] %vm43_vm1, %v341_v10  ;;  %49 = vst.msk [vmem:[#allocation3 + $0x8] sm:$0xff] %vm43_vm1, %v341_v10 }
  0x2b   :  { %280 = vmatprep.subr.bf16.mxu1 %v275_v7  ;;  %51 = vst.msk [vmem:[#allocation3 + $0x18] sm:$0xff] %vm43_vm1, %v341_v10 }
  0x2d   :  { %278 = vmatpush3.bf16.msra.mxu0 %v275_v7 }
  0x2e   :  { %282 = vmatpush3.bf16.msra.mxu1 %v275_v7  ;;  %v181_v19 = vld [vmem:[#allocation3 + $0x10] sm:$0xff] }
  0x2f   :  { %v159_v31 = vld [vmem:[#allocation2 + $0x8] sm:$0xff]  ;;  %v158_v32 = vld [vmem:[#allocation2] sm:$0xff] }
  0x30   :  { %266 = vmatmul.mubr.msk.f32.vlgmr.msra.gmra.mrb[0].mxu0 %vm60_vm0, %v53_v8  ;;  %v161_v38 = vld [vmem:[#allocation2 + $0x18] sm:$0xff]  ;;  %v160_v39 = vld [vmem:[#allocation2 + $0x10] sm:$0xff] }
  0x31   :  { %269 = vmatmul.mubr.msk.f32.vlgmr.msra.gmra.mrb[0].mxu1 %vm60_vm0, %v55_v9  ;;  %v179_v20 = vld [vmem:[#allocation3] sm:$0xff]  ;;  %v180_v26 = vld [vmem:[#allocation3 + $0x8] sm:$0xff] }
  0x32   :  { %v182_v25 = vld [vmem:[#allocation3 + $0x18] sm:$0xff] }
 0x103   :  { %v267_v11 = vpop.f32.mrb[0].mxu0 }
 0x104   :  { %v270_v12 = vpop.f32.mrb[0].mxu1  ;;  %v139_v13 = vpop.f32.mrb[1].mxu0  ;;  %v184_v18 = vmul.f32 %v267_v11, %v267_v11 }
 0x105   :  { %v149_v14 = vpop.f32.mrb[1].mxu1  ;;  %v183_v16 = vmul.f32 %v139_v13, %v139_v13  ;;  %v186_v17 = vmul.f32 %v270_v12, %v270_v12 }
 0x106   :  { %v185_v15 = vmul.f32 %v149_v14, %v149_v14 }
 0x107   :  { %187 = vadd.xlane.f32.xlu0 %v183_v16 }
 0x108   :  { %191 = vadd.xlane.f32.xlu1 %v185_v15 }
 0x10b   :  { %189 = vadd.xlane.f32.xlu0 %v184_v18 }
 0x10c   :  { %193 = vadd.xlane.f32.xlu1 %v186_v17 }
 0x10f   :  { %162 = vadd.xlane.f32.xlu0 %v139_v13 }
 0x110   :  { %164 = vadd.xlane.f32.xlu1 %v267_v11 }
 0x113   :  { %166 = vadd.xlane.f32.xlu0 %v149_v14 }
 0x114   :  { %168 = vadd.xlane.f32.xlu1 %v270_v12 }
 0x194   :  { %v188_v22 = vpop.xlane.xlu0 %187 }
 0x195   :  { %v192_v21 = vpop.xlane.xlu1 %191  ;;  %v195_v24 = vadd.f32 %v188_v22, %v179_v20 }
 0x196   :  { %v197_v23 = vadd.f32 %v192_v21, %v181_v19 }
 0x197   :  { %199 = vst.msk [vmem:[#allocation3] sm:$0xff] %vm43_vm1, %v195_v24 }
 0x198   :  { %201 = vst.msk [vmem:[#allocation3 + $0x10] sm:$0xff] %vm43_vm1, %v197_v23  ;;  %v190_v28 = vpop.xlane.xlu0 %189 }
 0x199   :  { %v194_v27 = vpop.xlane.xlu1 %193  ;;  %v196_v30 = vadd.f32 %v190_v28, %v180_v26 }
 0x19a   :  { %v198_v29 = vadd.f32 %v194_v27, %v182_v25 }
 0x19b   :  { %200 = vst.msk [vmem:[#allocation3 + $0x8] sm:$0xff] %vm43_vm1, %v196_v30 }
 0x19c   :  { %202 = vst.msk [vmem:[#allocation3 + $0x18] sm:$0xff] %vm43_vm1, %v198_v29  ;;  %v163_v34 = vpop.xlane.xlu0 %162 }
 0x19d   :  { %v165_v33 = vpop.xlane.xlu1 %164  ;;  %v170_v36 = vadd.f32 %v163_v34, %v158_v32 }
 0x19e   :  { %v171_v35 = vadd.f32 %v165_v33, %v159_v31  ;;  %v214_v37 = vld [vmem:[#allocation3] sm:$0xff] }
 0x19f   :  { %175 = vst.msk [vmem:[#allocation2] sm:$0xff] %vm43_vm1, %v170_v36  ;;  %222 = vrot.lane.b32.xlu0 %v214_v37, %s342_s1  ;;  %v216_v45 = vld [vmem:[#allocation3 + $0x10] sm:$0xff] }
 0x1a0   :  { %176 = vst.msk [vmem:[#allocation2 + $0x8] sm:$0xff] %vm43_vm1, %v171_v35  ;;  %v167_v41 = vpop.xlane.xlu0 %166 }
 0x1a1   :  { %v169_v40 = vpop.xlane.xlu1 %168  ;;  %v172_v43 = vadd.f32 %v167_v41, %v160_v39 }
 0x1a2   :  { %v173_v42 = vadd.f32 %v169_v40, %v161_v38  ;;  %v215_v44 = vld [vmem:[#allocation3 + $0x8] sm:$0xff] }
 0x1a3   :  { %177 = vst.msk [vmem:[#allocation2 + $0x10] sm:$0xff] %vm43_vm1, %v172_v43  ;;  %224 = vrot.lane.b32.xlu1 %v215_v44, %s342_s1  ;;  %v217_v48 = vld [vmem:[#allocation3 + $0x18] sm:$0xff] }
 0x1a4   :  { %178 = vst.msk [vmem:[#allocation2 + $0x18] sm:$0xff] %vm43_vm1, %v173_v42 }
 0x1a6   :  { %v206_v46 = vld [vmem:[#allocation2] sm:$0xff] }
 0x1a7   :  { %v207_v47 = vld [vmem:[#allocation2 + $0x8] sm:$0xff]  ;;  %226 = vrot.lane.b32.xlu1 %v216_v45, %s342_s1  ;;  %210 = vst.msk [vmem:[%s432_s2] sm:$0xff] %vm43_vm1, %v206_v46 }
 0x1a8   :  { %211 = vst.msk [vmem:[%s432_s2 + $0x8] sm:$0xff] %vm43_vm1, %v207_v47 }
 0x1aa   :  { %v208_v49 = vld [vmem:[#allocation2 + $0x10] sm:$0xff] }
 0x1ab   :  { %v209_v50 = vld [vmem:[#allocation2 + $0x18] sm:$0xff]  ;;  %228 = vrot.lane.b32.xlu1 %v217_v48, %s342_s1  ;;  %212 = vst.msk [vmem:[%s432_s2 + $0x10] sm:$0xff] %vm43_vm1, %v208_v49 }
 0x1ac   :  { %213 = vst.msk [vmem:[%s432_s2 + $0x18] sm:$0xff] %vm43_vm1, %v209_v50 }
 0x211   :  { %v223_v51 = vpop.permute.xlu0 %222 }
 0x212   :  { %235 = vst.msk [vmem:[%s432_s2] sm:$0xff] %vm234_vm2, %v223_v51 }
 0x215   :  { %v225_v52 = vpop.permute.xlu1 %224 }
 0x216   :  { %236 = vst.msk [vmem:[%s432_s2 + $0x8] sm:$0xff] %vm234_vm2, %v225_v52 }
 0x219   :  { %v227_v53 = vpop.permute.xlu1 %226 }
 0x21a   :  { %237 = vst.msk [vmem:[%s432_s2 + $0x10] sm:$0xff] %vm234_vm2, %v227_v53 }
 0x21d   :  { %v229_v54 = vpop.permute.xlu1 %228 }
 0x21e   :  { %238 = vst.msk [vmem:[%s432_s2 + $0x18] sm:$0xff] %vm234_vm2, %v229_v54 }
 0x21f   :  { %243 = vsyncpa [#allocation5], 1 }
 0x220   :  { %244 = vsyncpa [#allocation7], 1 }

</bundles_post_ra>
